<compile_context>
chip_gen: v6e
topology: v6e:2x2x1
jax: 0.10.0
libtpu: 0.0.40
codegen_flags: <defaults>
</compile_context>

<pallas_src>
import functools

import jax
import jax.numpy as jnp
from jax.experimental import pallas as pl
from jax.experimental.pallas import tpu as pltpu

MARGIN = 0.0   # nn.CosineEmbeddingLoss default
EPS = 1e-8     # cosine-similarity norm clamp


def _round_up(x, m):
    return ((x + m - 1) // m) * m


def _vmem_budget_bytes():
    """Per-generation usable VMEM budget (leave headroom for Mosaic internals)."""
    try:
        cap = int(pltpu.get_tpu_info().vmem_capacity_bytes)
    except Exception:
        cap = 64 << 20                         # conservative fallback: v7x per-TC VMEM
    # v7x (64 MiB) -> ~48 MiB budget; v5e/v6e (128 MiB) -> ~96 MiB budget.
    return int(min(cap * 3 // 4, 100 << 20))


def _pick_batch_block(bh):
    """Return (bb, bh_pad).  Prefer nb >= 2 (v7x megacore) with bb in the 8..32 range."""
    if bh < 16:
        return bh, bh                          # tiny batch: single block
    if bh <= 64 and bh % 2 == 0:
        return bh // 2, bh                     # nb == 2, bb up to 32, no padding
    bh_pad = _round_up(bh, 8)
    for cand in (32, 24, 16, 8):
        if bh_pad % cand == 0 and bh_pad // cand >= 2:
            return cand, bh_pad
    return 8, bh_pad


def _pick_time_block(t, bb, d, in_bytes, budget, resident_bytes):
    """Return (tt, t_pad).  Size tt so 2 operands x 2 buffers fit the VMEM budget; pad T
    up to a multiple of tt instead of ever falling back to a full-T tile."""
    avail = budget - resident_bytes - (4 << 20)
    tt_cap = avail // max(1, 4 * bb * d * in_bytes)
    tt_cap = max(16, min(512, (tt_cap // 16) * 16))   # multiple of 16 (bf16 sublanes)
    if t <= tt_cap:
        return t, t                            # single full-extent time block, no pad
    tt = int(tt_cap)
    return tt, _round_up(t, tt)


# --------------------------- fused forward kernel ---------------------------
def _fused_kernel(audio_ref, query_ref, y_ref, w_ref, b_ref,      # inputs
                  loss_ref,                                       # output
                  acc_a_ref, acc_q_ref,                           # VMEM scratch
                  *, total_t, margin, eps):
    t = pl.program_id(1)
    nt = pl.num_programs(1)

    # --- init pooling accumulators at the first time block of this batch block ---
    @pl.when(t == 0)
    def _():
        acc_a_ref[...] = jnp.zeros_like(acc_a_ref)
        acc_q_ref[...] = jnp.zeros_like(acc_q_ref)

    # --- streaming time-SUM (cast-on-load to f32; 1/T folded into the epilogue) ---
    acc_a_ref[...] += jnp.sum(audio_ref[...].astype(jnp.float32), axis=1)   # [Bb, D]
    acc_q_ref[...] += jnp.sum(query_ref[...].astype(jnp.float32), axis=1)   # [Bb, D]

    # --- finalize: embedding head + cosine embedding loss (all f32, tiny) ---
    @pl.when(t == nt - 1)
    def _():
        inv_t = jnp.float32(1.0 / total_t)
        w = w_ref[...]                                   # [D, E_pad] f32
        bias = b_ref[...]                                # [1, E_pad] f32

        # emb = mean_t(x) @ W + b  ==  (sum_t(x) @ W) * (1/T) + b
        emb_a = jnp.dot(acc_a_ref[...], w,
                        preferred_element_type=jnp.float32) * inv_t + bias   # [Bb, E_pad]
        emb_q = jnp.dot(acc_q_ref[...], w,
                        preferred_element_type=jnp.float32) * inv_t + bias   # [Bb, E_pad]

        dot = jnp.sum(emb_a * emb_q, axis=-1, keepdims=True)    # [Bb, 1]
        sa = jnp.sum(emb_a * emb_a, axis=-1, keepdims=True)     # [Bb, 1]
        sq = jnp.sum(emb_q * emb_q, axis=-1, keepdims=True)     # [Bb, 1]
        # Two rsqrt factors (EUP) -- avoids overflow of |a|^2 * |q|^2 in f32.
        eps2 = jnp.float32(eps * eps)
        inv_na = jax.lax.rsqrt(jnp.maximum(sa, eps2))
        inv_nq = jax.lax.rsqrt(jnp.maximum(sq, eps2))
        cos = dot * inv_na * inv_nq                             # [Bb, 1]

        y = y_ref[...]                                          # [Bb, 1] (+1 / -1)
        per = jnp.where(y > 0, 1.0 - cos, jnp.maximum(cos - margin, 0.0))   # [Bb, 1]
        # Lane-dense per-sample loss slab; host reads column 0 and takes the mean.
        loss_ref[...] = jnp.broadcast_to(per, loss_ref.shape)   # [Bb, 128]


def fused_embedding_cosine_loss(features, labels, w_pad, b_pad):
    """features: [2*Bh, T, D] (audio half on top of query half, any float dtype);
       labels: [Bh] (+1/-1); w_pad: [D, E_pad] f32; b_pad: [1, E_pad] f32."""
    two_bh, T, D = features.shape
    assert two_bh % 2 == 0, "batch must contain equal audio/query halves"
    bh = two_bh // 2
    assert labels.shape[0] == bh, "labels must have length B // 2"
    e_pad = w_pad.shape[1]
    in_bytes = jnp.dtype(features.dtype).itemsize          # 2 for bf16, 4 for f32

    budget = _vmem_budget_bytes()
    bb, bh_pad = _pick_batch_block(bh)
    nb = bh_pad // bb
    resident = (2 * (D * e_pad + e_pad) * 4                 # W + b (x2 buffers)
                + 2 * bb * D * 4                            # pooling accumulators
                + 4 * bb * 128 * 4                          # output slab buffers
                + 4 * bb * 4)                               # labels
    tt, T_pad = _pick_time_block(T, bb, D, in_bytes, budget, resident)
    nt = T_pad // tt

    # Zero-copy fast path: feed `features` itself to the kernel twice -- the query half
    # is reached purely through the BlockSpec index_map offset (i + nb), so the two
    # half-batches are never sliced/copied on the host.
    if bh_pad == bh and T_pad == T:
        feats = features
    else:
        # TODO(synk): padding path copies once; only hit for awkward (Bh, T) shapes.
        def _pad_half(x):
            return jnp.pad(x, ((0, bh_pad - bh), (0, T_pad - T), (0, 0)))
        feats = jnp.concatenate([_pad_half(features[:bh]), _pad_half(features[bh:])],
                                axis=0)

    labels_col = jnp.pad(labels.astype(jnp.float32), (0, bh_pad - bh),
                         constant_values=1.0).reshape(-1, 1)

    stream_bytes = 4 * bb * tt * D * in_bytes               # 2 operands x 2 buffers
    vmem_limit = int(min(max(stream_bytes + resident + (4 << 20), 16 << 20), budget))

    cost = pl.CostEstimate(
        flops=int(2 * bh_pad * T_pad * D + 4 * bh_pad * D * e_pad + 12 * bh_pad * e_pad),
        transcendentals=int(2 * bh_pad),
        bytes_accessed=int(2 * bh_pad * T_pad * D * in_bytes
                           + (D * e_pad + e_pad) * 4
                           + bh_pad * 4 + bh_pad * 128 * 4),
    )

    kernel = functools.partial(_fused_kernel, total_t=T, margin=MARGIN, eps=EPS)

    per_sample = pl.pallas_call(
        kernel,
        out_shape=jax.ShapeDtypeStruct((bh_pad, 128), jnp.float32),
        grid_spec=pltpu.PrefetchScalarGridSpec(
            num_scalar_prefetch=0,
            grid=(nb, nt),                                           # time (reduction) last
            in_specs=[
                pl.BlockSpec((bb, tt, D), lambda i, t: (i, t, 0)),       # audio half
                pl.BlockSpec((bb, tt, D), lambda i, t: (i + nb, t, 0)),  # query half (same buffer)
                pl.BlockSpec((bb, 1), lambda i, t: (i, 0)),              # labels (+1/-1)
                pl.BlockSpec((D, e_pad), lambda i, t: (0, 0)),           # W (DMA'd once)
                pl.BlockSpec((1, e_pad), lambda i, t: (0, 0)),           # b (DMA'd once)
            ],
            out_specs=pl.BlockSpec((bb, 128), lambda i, t: (i, 0)),  # lane-dense per-sample loss
            scratch_shapes=[
                pltpu.VMEM((bb, D), jnp.float32),                    # audio time-sum
                pltpu.VMEM((bb, D), jnp.float32),                    # query time-sum
            ],
        ),
        compiler_params=pltpu.CompilerParams(
            dimension_semantics=("parallel", "arbitrary"),
            vmem_limit_bytes=vmem_limit,
        ),
        cost_estimate=cost,
    )(feats, feats, labels_col, w_pad, b_pad)

    # Tiny host-side mean over the true Bh per-sample losses.
    return jnp.mean(per_sample[:bh, 0])


# ----------------------------- Expert wrapper -----------------------------
class DownstreamExpertPallas:
    """Pallas analogue of DownstreamExpert: embedding model + CosineEmbeddingLoss,
    fused into a single TPU kernel."""

    def __init__(self, upstream_dim: int, emb_dim: int, key):
        self.upstream_dim = upstream_dim
        self.emb_dim = emb_dim
        e_pad = _round_up(emb_dim, 128)

        kw, _ = jax.random.split(key)
        w = jax.random.normal(kw, (upstream_dim, emb_dim), jnp.float32) * 0.02
        b = jnp.zeros((emb_dim,), jnp.float32)

        # Lane-dense zero-padded params for the kernel: padded embedding lanes are
        # exactly 0 for every sample, so they contribute 0 to dot/norms and leave the
        # cosine loss unchanged.  (Params stay f32; only the streamed features are bf16.)
        self.w_pad = jnp.zeros((upstream_dim, e_pad), jnp.float32).at[:, :emb_dim].set(w)
        self.b_pad = jnp.zeros((1, e_pad), jnp.float32).at[:, :emb_dim].set(b)
        # Unpadded copies for the pure-JAX reference.
        self.w = w
        self.b = b

    def forward(self, features, labels):
        # features: [B, T, D] stacked frame features; first half audio, second half query.
        # Features are streamed in their native dtype (bf16 recommended) -- no host-side
        # slicing into halves, no dtype conversion copies.
        return fused_embedding_cosine_loss(features, labels, self.w_pad, self.b_pad)


# ----------------------------- reference check -----------------------------
def _reference_forward(features, labels, w, b):
    x = features.astype(jnp.float32)
    n = x.shape[0] // 2

    def model(z):
        return jnp.mean(z, axis=1) @ w + b

    a = model(x[:n])
    q = model(x[n:])
    dot = jnp.sum(a * q, axis=-1)
    sa = jnp.sum(a * a, axis=-1)
    sq = jnp.sum(q * q, axis=-1)
    eps2 = EPS * EPS
    cos = dot * jax.lax.rsqrt(jnp.maximum(sa, eps2)) * jax.lax.rsqrt(jnp.maximum(sq, eps2))
    y = labels.astype(jnp.float32)
    per = jnp.where(y > 0, 1.0 - cos, jnp.maximum(cos - MARGIN, 0.0))
    return jnp.mean(per)


if __name__ == "__main__":
    key = jax.random.PRNGKey(0)
    k_feat, k_param = jax.random.split(key)

    B = 8          # total stacked feature tensors (4 audio + 4 query)
    T = 8          # frames per utterance
    D = 32         # upstream_dim
    E = 16         # embedding dim (padded to 128 lanes inside the expert)

    # Upstream features streamed in bf16 (halves HBM traffic); accumulation is f32.
    features = jax.random.normal(k_feat, (B, T, D), jnp.float32).astype(jnp.bfloat16)
    labels = jnp.array([1, -1, 1, -1], dtype=jnp.int32)   # +1 match / -1 mismatch

    expert = DownstreamExpertPallas(upstream_dim=D, emb_dim=E, key=k_param)
    loss = expert.forward(features, labels)
    loss = jax.block_until_ready(loss)

    ref = _reference_forward(features, labels, expert.w, expert.b)
    assert jnp.allclose(loss, ref, atol=2e-4, rtol=1e-3), (loss, ref)

    print("KERNEL_OK")
</pallas_src>

<mosaic_0001>
module attributes {stable_mosaic.version = 11 : i64} {
  func.func @_fused_kernel(%arg0: i32, %arg1: i32, %arg2: memref<4x8x32xbf16, #tpu.memory_space<vmem>>, %arg3: memref<4x8x32xbf16, #tpu.memory_space<vmem>>, %arg4: memref<4x1xf32, #tpu.memory_space<vmem>>, %arg5: memref<32x128xf32, #tpu.memory_space<vmem>>, %arg6: memref<1x128xf32, #tpu.memory_space<vmem>>, %arg7: memref<4x128xf32, #tpu.memory_space<vmem>>, %arg8: memref<4x32xf32, #tpu.memory_space<vmem>>, %arg9: memref<4x32xf32, #tpu.memory_space<vmem>>) attributes {dimension_semantics = [#tpu.dimension_semantics<parallel>, #tpu.dimension_semantics<arbitrary>], iteration_bounds = array<i64: 1, 1>, scalar_prefetch = 0 : i64, scratch_operands = 2 : i64, tpu.core_type = #tpu.core_type<tc>, window_params = [{transform_indices = @transform_0, window_bounds = array<i64: 4, 8, 32>}, {transform_indices = @transform_1, window_bounds = array<i64: 4, 8, 32>}, {transform_indices = @transform_2, window_bounds = array<i64: 4, 1>}, {pipeline_mode = #tpu.pipeline_mode<synchronous>, transform_indices = @transform_3, window_bounds = array<i64: 32, 128>}, {pipeline_mode = #tpu.pipeline_mode<synchronous>, transform_indices = @transform_4, window_bounds = array<i64: 1, 128>}, {transform_indices = @transform_5, window_bounds = array<i64: 4, 128>}]} {
    %c0_i32 = arith.constant 0 : i32
    %0 = arith.cmpi eq, %arg1, %c0_i32 : i32
    %1 = arith.extui %0 : i1 to i32
    %c0_i32_0 = arith.constant 0 : i32
    %2 = arith.cmpi ne, %1, %c0_i32_0 : i32
    scf.if %2 {
      %cst_17 = arith.constant 0.000000e+00 : f32
      %18 = vector.broadcast %cst_17 : f32 to vector<4x32xf32>
      %c0_18 = arith.constant 0 : index
      %c0_19 = arith.constant 0 : index
      %19 = vector.load %arg8[%c0_18, %c0_19] : memref<4x32xf32, #tpu.memory_space<vmem>>, vector<4x32xf32>
      tpu.vector_store %arg8[%c0_18, %c0_19], %18 {strides = array<i32>} : memref<4x32xf32, #tpu.memory_space<vmem>>, vector<4x32xf32>,
      %cst_20 = arith.constant 0.000000e+00 : f32
      %20 = vector.broadcast %cst_20 : f32 to vector<4x32xf32>
      %c0_21 = arith.constant 0 : index
      %c0_22 = arith.constant 0 : index
      %21 = vector.load %arg9[%c0_21, %c0_22] : memref<4x32xf32, #tpu.memory_space<vmem>>, vector<4x32xf32>
      tpu.vector_store %arg9[%c0_21, %c0_22], %20 {strides = array<i32>} : memref<4x32xf32, #tpu.memory_space<vmem>>, vector<4x32xf32>,
    } else {
    }
    %c0 = arith.constant 0 : index
    %c0_1 = arith.constant 0 : index
    %3 = vector.load %arg8[%c0, %c0_1] : memref<4x32xf32, #tpu.memory_space<vmem>>, vector<4x32xf32>
    %c0_2 = arith.constant 0 : index
    %c0_3 = arith.constant 0 : index
    %c0_4 = arith.constant 0 : index
    %4 = vector.load %arg2[%c0_2, %c0_3, %c0_4] : memref<4x8x32xbf16, #tpu.memory_space<vmem>>, vector<4x8x32xbf16>
    %5 = arith.extf %4 : vector<4x8x32xbf16> to vector<4x8x32xf32>
    %cst = arith.constant dense<0.000000e+00> : vector<4x32xf32>
    %6 = vector.multi_reduction <add>, %5, %cst [1] : vector<4x8x32xf32> to vector<4x32xf32>
    %7 = arith.addf %3, %6 : vector<4x32xf32>
    %c0_5 = arith.constant 0 : index
    %c0_6 = arith.constant 0 : index
    %8 = vector.load %arg8[%c0_5, %c0_6] : memref<4x32xf32, #tpu.memory_space<vmem>>, vector<4x32xf32>
    tpu.vector_store %arg8[%c0_5, %c0_6], %7 {strides = array<i32>} : memref<4x32xf32, #tpu.memory_space<vmem>>, vector<4x32xf32>,
    %c0_7 = arith.constant 0 : index
    %c0_8 = arith.constant 0 : index
    %9 = vector.load %arg9[%c0_7, %c0_8] : memref<4x32xf32, #tpu.memory_space<vmem>>, vector<4x32xf32>
    %c0_9 = arith.constant 0 : index
    %c0_10 = arith.constant 0 : index
    %c0_11 = arith.constant 0 : index
    %10 = vector.load %arg3[%c0_9, %c0_10, %c0_11] : memref<4x8x32xbf16, #tpu.memory_space<vmem>>, vector<4x8x32xbf16>
    %11 = arith.extf %10 : vector<4x8x32xbf16> to vector<4x8x32xf32>
    %cst_12 = arith.constant dense<0.000000e+00> : vector<4x32xf32>
    %12 = vector.multi_reduction <add>, %11, %cst_12 [1] : vector<4x8x32xf32> to vector<4x32xf32>
    %13 = arith.addf %9, %12 : vector<4x32xf32>
    %c0_13 = arith.constant 0 : index
    %c0_14 = arith.constant 0 : index
    %14 = vector.load %arg9[%c0_13, %c0_14] : memref<4x32xf32, #tpu.memory_space<vmem>>, vector<4x32xf32>
    tpu.vector_store %arg9[%c0_13, %c0_14], %13 {strides = array<i32>} : memref<4x32xf32, #tpu.memory_space<vmem>>, vector<4x32xf32>,
    %c0_i32_15 = arith.constant 0 : i32
    %15 = arith.cmpi eq, %arg1, %c0_i32_15 : i32
    %16 = arith.extui %15 : i1 to i32
    %c0_i32_16 = arith.constant 0 : i32
    %17 = arith.cmpi ne, %16, %c0_i32_16 : i32
    scf.if %17 {
      %c0_17 = arith.constant 0 : index
      %c0_18 = arith.constant 0 : index
      %18 = vector.load %arg5[%c0_17, %c0_18] : memref<32x128xf32, #tpu.memory_space<vmem>>, vector<32x128xf32>
      %c0_19 = arith.constant 0 : index
      %c0_20 = arith.constant 0 : index
      %19 = vector.load %arg6[%c0_19, %c0_20] : memref<1x128xf32, #tpu.memory_space<vmem>>, vector<1x128xf32>
      %c0_21 = arith.constant 0 : index
      %c0_22 = arith.constant 0 : index
      %20 = vector.load %arg8[%c0_21, %c0_22] : memref<4x32xf32, #tpu.memory_space<vmem>>, vector<4x32xf32>
      %cst_23 = arith.constant dense<0.000000e+00> : vector<4x128xf32>
      %21 = tpu.matmul %20, %18, %cst_23 {dimension_numbers = #tpu.dot_dimension_numbers<[1], [0], [0], [1], [0, 0, 1, 1], [], []>} : vector<4x32xf32>, vector<32x128xf32>, vector<4x128xf32> -> vector<4x128xf32>
      %cst_24 = arith.constant 1.250000e-01 : f32
      %22 = vector.broadcast %cst_24 : f32 to vector<4x128xf32>
      %23 = arith.mulf %21, %22 : vector<4x128xf32>
      %24 = vector.broadcast %19 : vector<1x128xf32> to vector<4x128xf32>
      %25 = arith.addf %23, %24 : vector<4x128xf32>
      %c0_25 = arith.constant 0 : index
      %c0_26 = arith.constant 0 : index
      %26 = vector.load %arg9[%c0_25, %c0_26] : memref<4x32xf32, #tpu.memory_space<vmem>>, vector<4x32xf32>
      %cst_27 = arith.constant dense<0.000000e+00> : vector<4x128xf32>
      %27 = tpu.matmul %26, %18, %cst_27 {dimension_numbers = #tpu.dot_dimension_numbers<[1], [0], [0], [1], [0, 0, 1, 1], [], []>} : vector<4x32xf32>, vector<32x128xf32>, vector<4x128xf32> -> vector<4x128xf32>
      %cst_28 = arith.constant 1.250000e-01 : f32
      %28 = vector.broadcast %cst_28 : f32 to vector<4x128xf32>
      %29 = arith.mulf %27, %28 : vector<4x128xf32>
      %30 = vector.broadcast %19 : vector<1x128xf32> to vector<4x128xf32>
      %31 = arith.addf %29, %30 : vector<4x128xf32>
      %32 = arith.mulf %25, %31 : vector<4x128xf32>
      %cst_29 = arith.constant dense<0.000000e+00> : vector<4xf32>
      %33 = vector.multi_reduction <add>, %32, %cst_29 [1] : vector<4x128xf32> to vector<4xf32>
      %34 = vector.shape_cast %33 : vector<4xf32> to vector<4x1xf32>
      %35 = arith.mulf %25, %25 : vector<4x128xf32>
      %cst_30 = arith.constant dense<0.000000e+00> : vector<4xf32>
      %36 = vector.multi_reduction <add>, %35, %cst_30 [1] : vector<4x128xf32> to vector<4xf32>
      %37 = vector.shape_cast %36 : vector<4xf32> to vector<4x1xf32>
      %38 = arith.mulf %31, %31 : vector<4x128xf32>
      %cst_31 = arith.constant dense<0.000000e+00> : vector<4xf32>
      %39 = vector.multi_reduction <add>, %38, %cst_31 [1] : vector<4x128xf32> to vector<4xf32>
      %40 = vector.shape_cast %39 : vector<4xf32> to vector<4x1xf32>
      %cst_32 = arith.constant 1.000000e-16 : f32
      %41 = vector.broadcast %cst_32 : f32 to vector<4x1xf32>
      %42 = arith.maximumf %37, %41 : vector<4x1xf32>
      %43 = math.rsqrt %42 : vector<4x1xf32>
      %cst_33 = arith.constant 1.000000e-16 : f32
      %44 = vector.broadcast %cst_33 : f32 to vector<4x1xf32>
      %45 = arith.maximumf %40, %44 : vector<4x1xf32>
      %46 = math.rsqrt %45 : vector<4x1xf32>
      %47 = arith.mulf %34, %43 : vector<4x1xf32>
      %48 = arith.mulf %47, %46 : vector<4x1xf32>
      %c0_34 = arith.constant 0 : index
      %c0_35 = arith.constant 0 : index
      %49 = vector.load %arg4[%c0_34, %c0_35] : memref<4x1xf32, #tpu.memory_space<vmem>>, vector<4x1xf32>
      %cst_36 = arith.constant 0.000000e+00 : f32
      %50 = vector.broadcast %cst_36 : f32 to vector<4x1xf32>
      %51 = arith.cmpf ogt, %49, %50 : vector<4x1xf32>
      %cst_37 = arith.constant 1.000000e+00 : f32
      %52 = vector.broadcast %cst_37 : f32 to vector<4x1xf32>
      %53 = arith.subf %52, %48 : vector<4x1xf32>
      %cst_38 = arith.constant 0.000000e+00 : f32
      %54 = vector.broadcast %cst_38 : f32 to vector<4x1xf32>
      %55 = arith.subf %48, %54 : vector<4x1xf32>
      %cst_39 = arith.constant 0.000000e+00 : f32
      %56 = vector.broadcast %cst_39 : f32 to vector<4x1xf32>
      %57 = arith.maximumf %55, %56 : vector<4x1xf32>
      %58 = arith.select %51, %53, %57 : vector<4x1xi1>, vector<4x1xf32>
      %59 = vector.shape_cast %58 : vector<4x1xf32> to vector<4x1xf32>
      %60 = vector.broadcast %59 : vector<4x1xf32> to vector<4x128xf32>
      %c0_40 = arith.constant 0 : index
      %c0_41 = arith.constant 0 : index
      %61 = vector.load %arg7[%c0_40, %c0_41] : memref<4x128xf32, #tpu.memory_space<vmem>>, vector<4x128xf32>
      tpu.vector_store %arg7[%c0_40, %c0_41], %60 {strides = array<i32>} : memref<4x128xf32, #tpu.memory_space<vmem>>, vector<4x128xf32>,
    } else {
    }
    return
  }
  func.func @transform_0(%arg0: i32, %arg1: i32) -> (i32, i32, i32) {
    %c0_i32 = arith.constant 0 : i32
    %c0_i32_0 = arith.constant 0 : i32
    return %arg0, %arg1, %c0_i32 : i32, i32, i32
  }
  func.func @transform_1(%arg0: i32, %arg1: i32) -> (i32, i32, i32) {
    %c1_i32 = arith.constant 1 : i32
    %0 = arith.addi %arg0, %c1_i32 : i32
    %c0_i32 = arith.constant 0 : i32
    %c0_i32_0 = arith.constant 0 : i32
    return %0, %arg1, %c0_i32 : i32, i32, i32
  }
  func.func @transform_2(%arg0: i32, %arg1: i32) -> (i32, i32) {
    %c0_i32 = arith.constant 0 : i32
    %c0_i32_0 = arith.constant 0 : i32
    return %arg0, %c0_i32 : i32, i32
  }
  func.func @transform_3(%arg0: i32, %arg1: i32) -> (i32, i32) {
    %c0_i32 = arith.constant 0 : i32
    %c0_i32_0 = arith.constant 0 : i32
    %c0_i32_1 = arith.constant 0 : i32
    return %c0_i32, %c0_i32_0 : i32, i32
  }
  func.func @transform_4(%arg0: i32, %arg1: i32) -> (i32, i32) {
    %c0_i32 = arith.constant 0 : i32
    %c0_i32_0 = arith.constant 0 : i32
    %c0_i32_1 = arith.constant 0 : i32
    return %c0_i32, %c0_i32_0 : i32, i32
  }
  func.func @transform_5(%arg0: i32, %arg1: i32) -> (i32, i32) {
    %c0_i32 = arith.constant 0 : i32
    %c0_i32_0 = arith.constant 0 : i32
    return %arg0, %c0_i32 : i32, i32
  }
}

</mosaic_0001>

<bundles_post_ra>
// kernel: tpu_custom_call.1
= control target key start
LH: loop header
LB: loop body
LE: loop exit
PB: predicated region body
PF: predicated region fallthrough
CT: control target
= control target key end

     0   :  { %10 = vsyncpa [#allocation5], 0  ;;  %s625_s0 = inlined_call_operand.hbm [shape: bf16[8,8,32], index: 0, kind: input, shape index: {}]   ;;  %s626_s1 = inlined_call_operand.hbm [shape: bf16[8,8,32], index: 1, kind: input, shape index: {}]   ;;  %s627_s2 = inlined_call_operand.vmem [shape: f32[4,1], index: 2, kind: input, shape index: {}]   ;;  %s628_s3 = inlined_call_operand.hbm [shape: f32[32,128], index: 3, kind: input, shape index: {}]   ;;  %s629_s4 = inlined_call_operand.vmem [shape: f32[1,128], index: 4, kind: input, shape index: {}]   ;;  %s630_s5 = inlined_call_operand.hbm [shape: f32[4,128], index: 5, kind: output, shape index: {}]  }
   0x1   :  { %11 = vsyncpa [#allocation8], 0 }
   0x2   :  { %12 = vsyncpa [#allocation6], 0  ;;  %s386_s20 = scalar_lea.hbm %s626_s1, 256  ;;  %s546_s21 = smov [#allocation7]  }
   0x3   :  { %s34_s22 = sshll.u32 %s546_s21, 4  ;;  %s547_s23 = smov [#allocation4]   ;;  %s35_s22 = int_to_ptr.vmem [resolvable:$true] %s34_s22 }
   0x4   :  { %s18_s24 = sshll.u32 %s547_s23, 4  ;;  %s467_s25 = scalar_lea.vmem %s35_s22, 256  ;;  %s19_s24 = int_to_ptr.vmem [resolvable:$true] %s18_s24 }
   0x5   :  { %p468_p0 = scmp.ne.s32.totalorder %s35_s22, %s467_s25  ;;  %p472_p1 = scmp.lt.s32.totalorder %s35_s22, %s35_s22 }
   0x6   :  { %p473_p2 = scmp.lt.s32.totalorder %s467_s25, %s467_s25 }
   0x8   :  { %p474_p3 = por %p473_p2, %p472_p1 }
   0xa   :  { %p475_p4 = pnand %p474_p3, %p468_p0 }
   0xc   :  { %478 = shalt.err (!%p475_p4)
}
   0xd   :  { %s548_s26 = smov 64   ;;  %s549_s27 = smov 4  }
   0xe   :  { %40 = dma.hbm_to_vmem [thread:$0]  %s386_s20, 256, %s35_s22, [#allocation8], %s548_s26, %s548_s26, %s549_s27  }
   0xf   :  { %s488_s28 = scalar_lea.vmem %s19_s24, 256  ;;  %p493_p6 = scmp.lt.s32.totalorder %s19_s24, %s19_s24 }
  0x10   :  { %p489_p5 = scmp.ne.s32.totalorder %s19_s24, %s488_s28  ;;  %p494_p7 = scmp.lt.s32.totalorder %s488_s28, %s488_s28 }
  0x12   :  { %p495_p8 = por %p494_p7, %p493_p6 }
  0x14   :  { %p496_p9 = pnand %p495_p8, %p489_p5 }
  0x16   :  { %499 = shalt.err (!%p496_p9)
}
  0x17   :  { %24 = dma.hbm_to_vmem [thread:$0]  %s625_s0, 256, %s19_s24, [#allocation5], %s548_s26, %s548_s26, %s549_s27  }
  0x18   :  { %s550_s30 = smov [#allocation9]  }
  0x19   :  { %s48_s6 = sshll.u32 %s550_s30, 4  ;;  %s49_s6 = int_to_ptr.vmem [resolvable:$true] %s48_s6 }
  0x1a   :  { %s508_s7 = scalar_lea.vmem %s49_s6, 512  ;;  %p513_p11 = scmp.lt.s32.totalorder %s49_s6, %s49_s6 }
  0x1b   :  { %p509_p10 = scmp.ne.s32.totalorder %s49_s6, %s508_s7  ;;  %p514_p12 = scmp.lt.s32.totalorder %s508_s7, %s508_s7 }
  0x1d   :  { %p515_p13 = por %p514_p12, %p513_p11 }
  0x1f   :  { %p516_p0 = pnand %p515_p13, %p509_p10 }
  0x21   :  { %519 = shalt.err (!%p516_p0)
}
  0x22   :  { %s551_s8 = smov 128   ;;  %s552_s9 = smov 8  }
  0x23   :  { %54 = dma.hbm_to_vmem [thread:$0]  %s628_s3, 512, %s49_s6, [#allocation8], %s551_s8, %s551_s8, %s552_s9  }
  0x24   :  { %540 = dma.done.wait [#allocation5], 256  }
  0x25   :  { %541 = vsyncadd [#allocation5], 4294967040 }
  0x26   :  { %542 = dma.done.wait [#allocation8], 768  }
  0x27   :  { %543 = vsyncadd [#allocation8], 4294966528  ;;  %vm72_vm0 = vcmask 257024   ;;  %v553_v0 = vmov 0.0   ;;  %vm554_vm1 = vmmov 0   ;;  %v180_v1 = vld [vmem:[#allocation9 + $0x18] sm:$0xff] }
  0x28   :  { %418 = vmatprep.subr.mxu0 %v553_v0  ;;  %429 = vmatprep.subr.mxu1 %v553_v0  ;;  %73 = vst.msk [vmem:[#allocation2] sm:$0xf] %vm72_vm0, %v553_v0  ;;  %74 = vst.msk [vmem:[#allocation3] sm:$0xf] %vm72_vm0, %v553_v0  ;;  %v179_v2 = vld [vmem:[#allocation9 + $0x10] sm:$0xff]  ;;  %v178_v3 = vld [vmem:[#allocation9 + $0x8] sm:$0xff] }
  0x29   :  { %426 = vmatprep.mubr.msk.f32.mxu0 %vm554_vm1, %v553_v0  ;;  %437 = vmatprep.mubr.msk.f32.mxu1 %vm554_vm1, %v553_v0  ;;  %v391_v4 = vld [vmem:[#allocation4] sm:$0xff]   ;;  %vm84_vm2 = vcmask 261120   ;;  %v406_v7 = vld [vmem:[#allocation4 + $0x8] sm:$0xff]   ;;  %v399_v8 = vld [vmem:[#allocation7] sm:$0xff]   ;;  %vm117_vm3 = vcmask 1041409   ;;  %vm119_vm4 = vcmask 1042434  }
  0x2a   :  { %419 = vmatpush3.msra.mxu0 %v180_v1  ;;  %430 = vmatpush3.msra.mxu1 %v180_v1  ;;  %v392_v5 = vunpack.c.l.bf16 %v391_v4  ;;  %v393_v6 = vunpack.c.h.bf16 %v391_v4  ;;  %v407_v9 = vld [vmem:[#allocation7 + $0x8] sm:$0xff]   ;;  %v396_v10 = vunpack.c.l.bf16 %v406_v7  ;;  %v397_v11 = vunpack.c.h.bf16 %v406_v7  ;;  %v177_v14 = vld [vmem:[#allocation9] sm:$0xff]  ;;  %s556_s13 = smov [#allocation10]  }
  0x2b   :  { %420 = vmatprep.subr.mxu0 %v553_v0  ;;  %431 = vmatprep.subr.mxu1 %v553_v0  ;;  %v400_v12 = vunpack.c.l.bf16 %v399_v8  ;;  %v401_v13 = vunpack.c.h.bf16 %v399_v8  ;;  %v404_v17 = vunpack.c.l.bf16 %v407_v9  ;;  %v405_v18 = vunpack.c.h.bf16 %v407_v9  ;;  %s376_s14 = sshll.u32 %s556_s13, 4  ;;  %s377_s14 = int_to_ptr.vmem [resolvable:$true] %s376_s14 }
  0x2c   :  { %421 = vmatpush3.msra.mxu0 %v179_v2  ;;  %432 = vmatpush3.msra.mxu1 %v179_v2  ;;  %v85_v15 = vsel %vm84_vm2, %v392_v5, 0.0  ;;  %v92_v16 = vsel %vm84_vm2, %v393_v6, 0.0  ;;  %v99_v21 = vsel %vm84_vm2, %v396_v10, 0.0  ;;  %v106_v22 = vsel %vm84_vm2, %v397_v11, 0.0  ;;  %s520_s15 = scalar_lea.vmem %s377_s14, 64  ;;  %p525_p2 = scmp.lt.s32.totalorder %s377_s14, %s377_s14 }
  0x2d   :  { %422 = vmatprep.subr.mxu0 %v553_v0  ;;  %433 = vmatprep.subr.mxu1 %v553_v0  ;;  %v86_v19 = vrot.slane %v85_v15, 4  ;;  %v93_v20 = vrot.slane %v92_v16, 4  ;;  %v100_v23 = vrot.slane %v99_v21, 4  ;;  %v107_v24 = vrot.slane %v106_v22, 4  ;;  %p521_p1 = scmp.ne.s32.totalorder %s377_s14, %s520_s15  ;;  %p526_p3 = scmp.lt.s32.totalorder %s520_s15, %s520_s15 }
  0x2e   :  { %423 = vmatpush3.msra.mxu0 %v178_v3  ;;  %434 = vmatpush3.msra.mxu1 %v178_v3  ;;  %v136_v25 = vsel %vm84_vm2, %v400_v12, 0.0  ;;  %v143_v26 = vsel %vm84_vm2, %v401_v13, 0.0  ;;  %vm121_vm5 = vcmask 1043459   ;;  %v150_v33 = vsel %vm84_vm2, %v404_v17, 0.0 }
  0x2f   :  { %424 = vmatprep.subr.mxu0 %v553_v0  ;;  %435 = vmatprep.subr.mxu1 %v553_v0  ;;  %v87_v27 = vadd.f32 %v86_v19, %v85_v15  ;;  %v94_v28 = vadd.f32 %v93_v20, %v92_v16  ;;  %v137_v29 = vrot.slane %v136_v25, 4  ;;  %v144_v30 = vrot.slane %v143_v26, 4  ;;  %v75_v3 = vld [vmem:[#allocation2] sm:$0xf]  ;;  %v127_v15 = vld [vmem:[#allocation3] sm:$0xf]  ;;  %p527_p4 = por %p526_p3, %p525_p2 }
  0x30   :  { %425 = vmatpush3.msra.mxu0 %v177_v14  ;;  %436 = vmatpush3.msra.mxu1 %v177_v14  ;;  %v101_v31 = vadd.f32 %v100_v23, %v99_v21  ;;  %v108_v32 = vadd.f32 %v107_v24, %v106_v22  ;;  %v157_v34 = vsel %vm84_vm2, %v405_v18, 0.0  ;;  %v151_v41 = vrot.slane %v150_v33, 4  ;;  %v388_v21 = vld [vmem:[%s629_s4] ss:$0 sm:$0xff] }
  0x31   :  { %v88_v35 = vrot.slane %v87_v27, 2  ;;  %v95_v36 = vrot.slane %v94_v28, 2  ;;  %v138_v37 = vadd.f32 %v137_v29, %v136_v25  ;;  %v145_v38 = vadd.f32 %v144_v30, %v143_v26  ;;  %p528_p5 = pnand %p527_p4, %p521_p1 }
  0x32   :  { %v102_v39 = vrot.slane %v101_v31, 2  ;;  %v109_v40 = vrot.slane %v108_v32, 2  ;;  %v158_v42 = vrot.slane %v157_v34, 4  ;;  %v152_v49 = vadd.f32 %v151_v41, %v150_v33 }
  0x33   :  { %v89_v43 = vadd.f32 %v88_v35, %v87_v27  ;;  %v96_v44 = vadd.f32 %v95_v36, %v94_v28  ;;  %v139_v45 = vrot.slane %v138_v37, 2  ;;  %v146_v46 = vrot.slane %v145_v38, 2 }
  0x34   :  { %v103_v47 = vadd.f32 %v102_v39, %v101_v31  ;;  %v110_v48 = vadd.f32 %v109_v40, %v108_v32  ;;  %v159_v50 = vadd.f32 %v158_v42, %v157_v34  ;;  %v153_v57 = vrot.slane %v152_v49, 2 }
  0x35   :  { %v90_v51 = vrot.slane %v89_v43, 1  ;;  %v97_v52 = vrot.slane %v96_v44, 1  ;;  %v140_v53 = vadd.f32 %v139_v45, %v138_v37  ;;  %v147_v54 = vadd.f32 %v146_v46, %v145_v38 }
  0x36   :  { %v104_v55 = vrot.slane %v103_v47, 1  ;;  %v111_v56 = vrot.slane %v110_v48, 1  ;;  %v160_v58 = vrot.slane %v159_v50, 2  ;;  %v154_v1 = vadd.f32 %v153_v57, %v152_v49 }
  0x37   :  { %v91_v59 = vadd.f32 %v90_v51, %v89_v43  ;;  %v98_v60 = vadd.f32 %v97_v52, %v96_v44  ;;  %v141_v61 = vrot.slane %v140_v53, 1  ;;  %v148_v62 = vrot.slane %v147_v54, 1  ;;  %v359_v44 = vld [vmem:[%s627_s2] sm:$0xf] }
  0x38   :  { %v105_v63 = vadd.f32 %v104_v55, %v103_v47  ;;  %v112_v0 = vadd.f32 %v111_v56, %v110_v48  ;;  %v161_v2 = vadd.f32 %v160_v58, %v159_v50  ;;  %v155_v8 = vrot.slane %v154_v1, 1 }
  0x39   :  { %v118_v4 = vsel %vm117_vm3, %v98_v60, %v91_v59  ;;  %v142_v5 = vadd.f32 %v141_v61, %v140_v53  ;;  %v149_v6 = vadd.f32 %v148_v62, %v147_v54  ;;  %vm341_vm6 = vcmask 1043456  }
  0x3a   :  { %v120_v7 = vsel %vm119_vm4, %v105_v63, %v118_v4  ;;  %v162_v9 = vrot.slane %v161_v2, 1  ;;  %v156_v13 = vadd.f32 %v155_v8, %v154_v1  ;;  %v555_v36 = vmov 0  }
  0x3b   :  { %v122_v10 = vsel %vm121_vm5, %v112_v0, %v120_v7  ;;  %v168_v11 = vsel %vm117_vm3, %v149_v6, %v142_v5  ;;  %451 = vset.pattern.permute.xlu1 %v555_v36  ;;  %452 = vset.pattern.permute.xlu0 %v555_v36  ;;  %vm360_vm7 = vcmp.gt.f32.partialorder %v359_v44, 0.0 }
  0x3c   :  { %v124_v12 = vadd.f32 %v122_v10, %v75_v3  ;;  %v163_v14 = vadd.f32 %v162_v9, %v161_v2  ;;  %v169_v16 = vsel %vm119_vm4, %v156_v13, %v168_v11 }
  0x3e   :  { %126 = vst.msk [vmem:[#allocation2] sm:$0xf] %vm72_vm0, %v124_v12  ;;  %v170_v17 = vsel %vm121_vm5, %v163_v14, %v169_v16 }
  0x3f   :  { %v172_v18 = vadd.f32 %v170_v17, %v127_v15 }
  0x41   :  { %173 = vst.msk [vmem:[#allocation3] sm:$0xf] %vm72_vm0, %v172_v18 }
  0x45   :  { %v182_v19 = vld [vmem:[#allocation2] sm:$0xf] }
  0x46   :  { %427 = vmatmul.mubr.msk.f32.vlgmr.msra.gmra.mxu0 %vm84_vm2, %v182_v19 }
  0x48   :  { %v264_v20 = vld [vmem:[#allocation3] sm:$0xf] }
  0x49   :  { %438 = vmatmul.mubr.msk.f32.vlgmr.msra.gmra.mxu1 %vm84_vm2, %v264_v20 }
 0x106   :  { %v252_v22 = vpop.f32.mrf.mxu0 }
 0x107   :  { %v256_v23 = vmul.f32 0.125, %v252_v22 }
 0x108   :  { %v428_v24 = vpop.f32.mrf.mxu0 }
 0x109   :  { %v263_v25 = vadd.f32 %v388_v21, %v256_v23  ;;  %v334_v26 = vpop.f32.mrf.mxu1 }
 0x10a   :  { %v338_v27 = vmul.f32 0.125, %v334_v26 }
 0x10b   :  { %v345_v28 = vmul.f32 %v263_v25, %v263_v25  ;;  %v439_v29 = vpop.f32.mrf.mxu1 }
 0x10c   :  { %v339_v30 = vadd.f32 %v388_v21, %v338_v27 }
 0x10d   :  { %v346_v31 = vsel %vm341_vm6, %v345_v28, 0.0 }
 0x10e   :  { %347 = vadd.xlane.f32.xlu0 %v346_v31  ;;  %v340_v32 = vmul.f32 %v339_v30, %v263_v25  ;;  %v349_v33 = vmul.f32 %v339_v30, %v339_v30 }
 0x110   :  { %v342_v34 = vsel %vm341_vm6, %v340_v32, 0.0  ;;  %v350_v35 = vsel %vm341_vm6, %v349_v33, 0.0 }
 0x111   :  { %343 = vadd.xlane.f32.xlu1 %v342_v34 }
 0x112   :  { %351 = vadd.xlane.f32.xlu0 %v350_v35 }
 0x197   :  { %v348_v37 = vpop.xlane.xlu0 %347 }
 0x198   :  { %v353_v38 = vmax.f32 %v348_v37, 1e-16 }
 0x19a   :  { %453 = vrsqrt.f32 %v353_v38  ;;  %v344_v42 = vpop.xlane.xlu1 %343 }
 0x19b   :  { %v352_v39 = vpop.xlane.xlu0 %351 }
 0x19c   :  { %v355_v40 = vmax.f32 %v352_v39, 1e-16 }
 0x19e   :  { %455 = vrsqrt.f32 %v355_v40 }
 0x1a7   :  { %v454_v41 = vpop.eup %453 }
 0x1a8   :  { %v357_v43 = vmul.f32 %v454_v41, %v344_v42 }
 0x1ab   :  { %v456_v45 = vpop.eup %455 }
 0x1ac   :  { %v358_v46 = vmul.f32 %v456_v45, %v357_v43 }
 0x1ae   :  { %v361_v47 = vsub.f32 1.0, %v358_v46  ;;  %v362_v48 = vmax.f32 %v358_v46, 0.0 }
 0x1b0   :  { %v363_v49 = vsel %vm360_vm7, %v361_v47, %v362_v48 }
 0x1b1   :  { %366 = vperm.xlu1 %451, %v363_v49  }
 0x22c   :  { %v367_v50 = vpop.permute.xlu1 %366 }
 0x22d   :  { %369 = vst [vmem:[#allocation10] sm:$0xf] %v367_v50 }
 0x22e   :  { %531 = shalt.err (!%p528_p5)
}
 0x22f   :  { %379 = dma.vmem_to_hbm [thread:$0]  %s377_s14, 64, %s630_s5, [#allocation6]  }
 0x230   :  { %544 = dma.done.wait [#allocation6], 64  }
 0x231   :  { %545 = vsyncadd [#allocation6], 4294967232 }
 0x232   :  { %383 = vsyncpa [#allocation5], 1 }
 0x233   :  { %384 = vsyncpa [#allocation8], 1 }
 0x234   :  { %385 = vsyncpa [#allocation6], 1 }

</bundles_post_ra>
